<compile_context>
chip_gen: v7x
topology: tpu7x:2x2x1
jax: 0.10.0
libtpu: 0.0.40
codegen_flags: <defaults>
</compile_context>

<pallas_src>
import functools

import jax
import jax.numpy as jnp
from jax import lax
from jax.experimental import pallas as pl
from jax.experimental.pallas import tpu as pltpu

_EPS = 1e-6
_DEFAULT_MAX_BLOCK_BYTES = 4 * 1024 * 1024   # per-input per-step VMEM block


def _round_up(x, m):
    return (x + m - 1) // m * m


def _cdiv(a, b):
    return (a + b - 1) // b


def _fold_factor(b, d, itemsize):
    """Power-of-two row fold so streamed blocks fill the sublanes (8 for f32,
    16 for packed dtypes) without shrinking the lane dim below 128."""
    target_rows = 8 if itemsize >= 4 else 16
    r = 1
    while b * r < target_rows and d % (2 * r) == 0 and d // (2 * r) >= 128:
        r *= 2
    return r


def _choose_tile(d_f, rows, itemsize, max_block_bytes):
    """Lane-aligned D-tile sized to the VMEM budget.  Waste is bounded to
    <128 columns per tile (never round the whole array up to the tile)."""
    if d_f * rows * itemsize <= max_block_bytes or d_f <= 128:
        return d_f, 1                                   # single full-width block
    cap = max(128, (max_block_bytes // (rows * itemsize)) // 128 * 128)
    d128 = _round_up(d_f, 128)
    k = _cdiv(d128, cap)
    td = _round_up(_cdiv(d128, k), 128)
    return td, _cdiv(d_f, td)


def _gram_kernel(x1_ref, x2_ref, a_ref, c_ref, *,
                 kpc, td1, td2, k1, k2, d1f, d2f, ragged1, ragged2):
    """Grid = (ncore [parallel], kpc [arbitrary]).  Each core accumulates its
    partial Gram matrices of both inputs into its own resident output block."""
    core = pl.program_id(0)
    k = pl.program_id(1)
    g = core * kpc + k                                  # global D-block index

    @pl.when(k == 0)
    def _init():
        a_ref[...] = jnp.zeros_like(a_ref)
        c_ref[...] = jnp.zeros_like(c_ref)

    def _accumulate(x_ref, acc_ref, td, k_valid, d_valid, ragged):
        @pl.when(g < k_valid)
        def _():
            x = x_ref[...]                              # (rows, td), input dtype
            if ragged:
                # Zero-mask lanes past the true feature width (the final block
                # of this input is only partially fetched from HBM).
                col = g * td + lax.broadcasted_iota(jnp.int32, x.shape, 1)
                x = jnp.where(col < d_valid, x, jnp.zeros_like(x))
            # Deep-K MXU matmul: contraction over the feature axis, tiny
            # (rows, rows) output, f32 accumulation into the resident block.
            acc_ref[0] = acc_ref[0] + lax.dot_general(
                x, x, dimension_numbers=(((1,), (1,)), ((), ())),
                preferred_element_type=jnp.float32)

    _accumulate(x1_ref, a_ref, td1, k1, d1f, ragged1)
    _accumulate(x2_ref, c_ref, td2, k2, d2f, ragged2)


def diff_loss(input1, input2, *, max_block_bytes=_DEFAULT_MAX_BLOCK_BYTES):
    """Pallas implementation of DiffLoss.forward(input1, input2)."""
    b = input1.shape[0]
    assert input2.shape[0] == b, "batch sizes must match"

    x1 = input1.reshape(b, -1)                # row-major flatten == torch .view
    x2 = input2.reshape(b, -1)
    d1, d2 = x1.shape[1], x2.shape[1]
    it1 = jnp.dtype(x1.dtype).itemsize
    it2 = jnp.dtype(x2.dtype).itemsize

    # Sublane fold (free reshape, no HBM copy): (B, D) -> (B*r, D/r).
    r1 = _fold_factor(b, d1, it1)
    r2 = _fold_factor(b, d2, it2)
    br1, br2 = b * r1, b * r2
    d1f, d2f = d1 // r1, d2 // r2
    x1f = x1.reshape(br1, d1f)
    x2f = x2.reshape(br2, d2f)

    # Tile widths / block counts per input (VMEM-budget driven).
    td1, k1 = _choose_tile(d1f, br1, it1, max_block_bytes)
    td2, k2 = _choose_tile(d2f, br2, it2, max_block_bytes)
    ragged1 = (d1f % td1) != 0
    ragged2 = (d2f % td2) != 0

    k_total = max(k1, k2)
    ncore = 2 if k_total >= 2 else 1          # split D across both TCs on v7x
    kpc = _cdiv(k_total, ncore)
    multibuf = kpc >= 3                       # deepen pipelining on long streams

    def _in_spec(rows, td, kv):
        idx = lambda c, k: (0, jnp.minimum(c * kpc + k, kv - 1))
        if multibuf:
            return pl.BlockSpec((rows, td), idx, pipeline_mode=pl.Buffered(3))
        return pl.BlockSpec((rows, td), idx)

    kernel = functools.partial(
        _gram_kernel, kpc=kpc, td1=td1, td2=td2, k1=k1, k2=k2,
        d1f=d1f, d2f=d2f, ragged1=ragged1, ragged2=ragged2)

    nbuf = 3 if multibuf else 2
    vmem_need = (nbuf * (br1 * td1 * it1 + br2 * td2 * it2)
                 + 2 * 4 * (br1 * br1 + br2 * br2))
    vmem_limit = int(min(48 << 20, max(vmem_need + (8 << 20), 32 << 20)))

    a_parts, c_parts = pl.pallas_call(
        kernel,
        out_shape=(jax.ShapeDtypeStruct((ncore, br1, br1), jnp.float32),
                   jax.ShapeDtypeStruct((ncore, br2, br2), jnp.float32)),
        grid_spec=pltpu.PrefetchScalarGridSpec(
            num_scalar_prefetch=0,
            grid=(ncore, kpc),
            in_specs=[_in_spec(br1, td1, k1), _in_spec(br2, td2, k2)],
            out_specs=[pl.BlockSpec((1, br1, br1), lambda c, k: (c, 0, 0)),
                       pl.BlockSpec((1, br2, br2), lambda c, k: (c, 0, 0))],
        ),
        compiler_params=pltpu.CompilerParams(
            dimension_semantics=("parallel", "arbitrary"),
            vmem_limit_bytes=vmem_limit,
        ),
    )(x1f, x2f)

    # Tiny O(B^2) finalize in plain JAX (also avoids any write race across the
    # parallel core axis): combine per-core partials, undo the row fold via a
    # block trace, derive norms from the Gram diagonals, weighted sum.
    a_sub = jnp.sum(a_parts, axis=0)                    # (BR1, BR1)
    c_sub = jnp.sum(c_parts, axis=0)                    # (BR2, BR2)
    gram1 = jnp.diagonal(a_sub.reshape(b, r1, b, r1), axis1=1, axis2=3).sum(-1)
    gram2 = jnp.diagonal(c_sub.reshape(b, r2, b, r2), axis1=1, axis2=3).sum(-1)
    n1 = jnp.sqrt(jnp.diagonal(gram1))                  # (B,) row norms of x1
    n2 = jnp.sqrt(jnp.diagonal(gram2))                  # (B,) row norms of x2
    w = 1.0 / ((n1 + _EPS) * (n2 + _EPS))               # (B,)
    total = jnp.sum(gram1 * gram2 * w[:, None] * w[None, :])
    return total * (1.0 / (float(d1) * float(d2)))      # mean over D1*D2


def _diff_loss_ref(input1, input2):
    """Pure-JAX reference mirroring the PyTorch code, for validation."""
    b = input1.shape[0]
    x1 = input1.reshape(b, -1).astype(jnp.float32)
    x2 = input2.reshape(b, -1).astype(jnp.float32)
    n1 = jnp.linalg.norm(x1, axis=1, keepdims=True)
    n2 = jnp.linalg.norm(x2, axis=1, keepdims=True)
    x1n = x1 / (n1 + _EPS)
    x2n = x2 / (n2 + _EPS)
    g = jnp.dot(x1n.T, x2n, precision=jax.lax.Precision.HIGHEST)
    return jnp.mean(g ** 2)


if __name__ == "__main__":
    key = jax.random.PRNGKey(0)
    ka, kb, kc, kd, ke = jax.random.split(key, 5)

    # Tolerance covers summation-order / MXU-pass differences between the
    # Gram-reformulated kernel and the direct (D1, D2) HIGHEST-precision ref.
    RTOL, ATOL = 2e-3, 1e-9

    # Small NCHW-like activations, as the DSN model would feed this loss.
    x1 = jax.random.normal(ka, (2, 4, 16, 16), dtype=jnp.float32)
    x2 = jax.random.normal(kb, (2, 4, 16, 16), dtype=jnp.float32)

    loss = jax.block_until_ready(diff_loss(x1, x2))
    ref = jax.block_until_ready(_diff_loss_ref(x1, x2))
    assert jnp.allclose(loss, ref, rtol=RTOL, atol=ATOL), (loss, ref)

    # Force multi-block streaming: dual-core grid split + 3-deep buffering.
    x4 = jax.random.normal(kc, (2, 4, 32, 32), dtype=jnp.float32)
    x5 = jax.random.normal(kd, (2, 4, 32, 32), dtype=jnp.float32)
    loss_tiled = jax.block_until_ready(diff_loss(x4, x5, max_block_bytes=1024))
    ref_tiled = jax.block_until_ready(_diff_loss_ref(x4, x5))
    assert jnp.allclose(loss_tiled, ref_tiled, rtol=RTOL, atol=ATOL), (loss_tiled, ref_tiled)

    # D1 != D2: clamped index_map + gated matmul for the narrow input, and a
    # ragged final D-tile that is zero-masked in-kernel.
    x3 = jax.random.normal(ke, (2, 10, 20, 10), dtype=jnp.float32)
    loss_mixed = jax.block_until_ready(diff_loss(x1, x3, max_block_bytes=1024))
    ref_mixed = jax.block_until_ready(_diff_loss_ref(x1, x3))
    assert jnp.allclose(loss_mixed, ref_mixed, rtol=RTOL, atol=ATOL), (loss_mixed, ref_mixed)

    # bf16 activations stay bf16 into the kernel (half the HBM traffic).
    x1b = x1.astype(jnp.bfloat16)
    x2b = x2.astype(jnp.bfloat16)
    loss_bf16 = jax.block_until_ready(diff_loss(x1b, x2b))
    ref_bf16 = jax.block_until_ready(_diff_loss_ref(x1b, x2b))
    assert jnp.allclose(loss_bf16, ref_bf16, rtol=1e-2, atol=1e-9), (loss_bf16, ref_bf16)

    print("KERNEL_OK")
</pallas_src>

<mosaic_0001>
module attributes {stable_mosaic.version = 11 : i64} {
  func.func @_gram_kernel(%arg0: i32, %arg1: i32, %arg2: memref<8x256xf32, #tpu.memory_space<vmem>>, %arg3: memref<8x256xf32, #tpu.memory_space<vmem>>, %arg4: memref<1x8x8xf32, #tpu.memory_space<vmem>>, %arg5: memref<1x8x8xf32, #tpu.memory_space<vmem>>) attributes {dimension_semantics = [#tpu.dimension_semantics<parallel>, #tpu.dimension_semantics<arbitrary>], iteration_bounds = array<i64: 1, 1>, scalar_prefetch = 0 : i64, scratch_operands = 0 : i64, tpu.core_type = #tpu.core_type<tc>, window_params = [{transform_indices = @transform_0, window_bounds = array<i64: 8, 256>}, {transform_indices = @transform_1, window_bounds = array<i64: 8, 256>}, {transform_indices = @transform_2, window_bounds = array<i64: 1, 8, 8>}, {transform_indices = @transform_3, window_bounds = array<i64: 1, 8, 8>}]} {
    %c1_i32 = arith.constant 1 : i32
    %0 = arith.muli %arg0, %c1_i32 : i32
    %1 = arith.addi %0, %arg1 : i32
    %c0_i32 = arith.constant 0 : i32
    %2 = arith.cmpi eq, %arg1, %c0_i32 : i32
    %3 = arith.extui %2 : i1 to i32
    %c0_i32_0 = arith.constant 0 : i32
    %4 = arith.cmpi ne, %3, %c0_i32_0 : i32
    scf.if %4 {
      %cst = arith.constant 0.000000e+00 : f32
      %11 = vector.broadcast %cst : f32 to vector<1x8x8xf32>
      %c0 = arith.constant 0 : index
      %c0_5 = arith.constant 0 : index
      %c0_6 = arith.constant 0 : index
      %12 = vector.load %arg4[%c0, %c0_5, %c0_6] : memref<1x8x8xf32, #tpu.memory_space<vmem>>, vector<1x8x8xf32>
      tpu.vector_store %arg4[%c0, %c0_5, %c0_6], %11 {strides = array<i32>} : memref<1x8x8xf32, #tpu.memory_space<vmem>>, vector<1x8x8xf32>,
      %cst_7 = arith.constant 0.000000e+00 : f32
      %13 = vector.broadcast %cst_7 : f32 to vector<1x8x8xf32>
      %c0_8 = arith.constant 0 : index
      %c0_9 = arith.constant 0 : index
      %c0_10 = arith.constant 0 : index
      %14 = vector.load %arg5[%c0_8, %c0_9, %c0_10] : memref<1x8x8xf32, #tpu.memory_space<vmem>>, vector<1x8x8xf32>
      tpu.vector_store %arg5[%c0_8, %c0_9, %c0_10], %13 {strides = array<i32>} : memref<1x8x8xf32, #tpu.memory_space<vmem>>, vector<1x8x8xf32>,
    } else {
    }
    %c1_i32_1 = arith.constant 1 : i32
    %5 = arith.cmpi slt, %1, %c1_i32_1 : i32
    %6 = arith.extui %5 : i1 to i32
    %c0_i32_2 = arith.constant 0 : i32
    %7 = arith.cmpi ne, %6, %c0_i32_2 : i32
    scf.if %7 {
      %c0 = arith.constant 0 : index
      %c0_5 = arith.constant 0 : index
      %11 = vector.load %arg2[%c0, %c0_5] : memref<8x256xf32, #tpu.memory_space<vmem>>, vector<8x256xf32>
      %c0_6 = arith.constant 0 : index
      %c0_7 = arith.constant 0 : index
      %c0_8 = arith.constant 0 : index
      %12 = vector.load %arg4[%c0_6, %c0_7, %c0_8] : memref<1x8x8xf32, #tpu.memory_space<vmem>>, vector<1x8x8xf32>
      %13 = vector.shape_cast %12 : vector<1x8x8xf32> to vector<8x8xf32>
      %cst = arith.constant dense<0.000000e+00> : vector<8x8xf32>
      %14 = tpu.matmul %11, %11, %cst {dimension_numbers = #tpu.dot_dimension_numbers<[1], [1], [0], [0], [0, 0, 1, 0], [], []>} : vector<8x256xf32>, vector<8x256xf32>, vector<8x8xf32> -> vector<8x8xf32>
      %15 = arith.addf %13, %14 : vector<8x8xf32>
      %c0_9 = arith.constant 0 : index
      %c0_10 = arith.constant 0 : index
      %c0_11 = arith.constant 0 : index
      %16 = vector.load %arg4[%c0_9, %c0_10, %c0_11] : memref<1x8x8xf32, #tpu.memory_space<vmem>>, vector<1x8x8xf32>
      %17 = vector.shape_cast %16 : vector<1x8x8xf32> to vector<8x8xf32>
      %18 = vector.shape_cast %15 : vector<8x8xf32> to vector<1x8x8xf32>
      tpu.vector_store %arg4[%c0_9, %c0_10, %c0_11], %18 {strides = array<i32>} : memref<1x8x8xf32, #tpu.memory_space<vmem>>, vector<1x8x8xf32>,
    } else {
    }
    %c1_i32_3 = arith.constant 1 : i32
    %8 = arith.cmpi slt, %1, %c1_i32_3 : i32
    %9 = arith.extui %8 : i1 to i32
    %c0_i32_4 = arith.constant 0 : i32
    %10 = arith.cmpi ne, %9, %c0_i32_4 : i32
    scf.if %10 {
      %c0 = arith.constant 0 : index
      %c0_5 = arith.constant 0 : index
      %11 = vector.load %arg3[%c0, %c0_5] : memref<8x256xf32, #tpu.memory_space<vmem>>, vector<8x256xf32>
      %c0_6 = arith.constant 0 : index
      %c0_7 = arith.constant 0 : index
      %c0_8 = arith.constant 0 : index
      %12 = vector.load %arg5[%c0_6, %c0_7, %c0_8] : memref<1x8x8xf32, #tpu.memory_space<vmem>>, vector<1x8x8xf32>
      %13 = vector.shape_cast %12 : vector<1x8x8xf32> to vector<8x8xf32>
      %cst = arith.constant dense<0.000000e+00> : vector<8x8xf32>
      %14 = tpu.matmul %11, %11, %cst {dimension_numbers = #tpu.dot_dimension_numbers<[1], [1], [0], [0], [0, 0, 1, 0], [], []>} : vector<8x256xf32>, vector<8x256xf32>, vector<8x8xf32> -> vector<8x8xf32>
      %15 = arith.addf %13, %14 : vector<8x8xf32>
      %c0_9 = arith.constant 0 : index
      %c0_10 = arith.constant 0 : index
      %c0_11 = arith.constant 0 : index
      %16 = vector.load %arg5[%c0_9, %c0_10, %c0_11] : memref<1x8x8xf32, #tpu.memory_space<vmem>>, vector<1x8x8xf32>
      %17 = vector.shape_cast %16 : vector<1x8x8xf32> to vector<8x8xf32>
      %18 = vector.shape_cast %15 : vector<8x8xf32> to vector<1x8x8xf32>
      tpu.vector_store %arg5[%c0_9, %c0_10, %c0_11], %18 {strides = array<i32>} : memref<1x8x8xf32, #tpu.memory_space<vmem>>, vector<1x8x8xf32>,
    } else {
    }
    return
  }
  func.func @transform_0(%arg0: i32, %arg1: i32) -> (i32, i32) {
    %c1_i32 = arith.constant 1 : i32
    %0 = arith.muli %arg0, %c1_i32 : i32
    %1 = arith.addi %0, %arg1 : i32
    %c0_i32 = arith.constant 0 : i32
    %2 = arith.minsi %1, %c0_i32 : i32
    %c0_i32_0 = arith.constant 0 : i32
    %c0_i32_1 = arith.constant 0 : i32
    return %c0_i32_0, %2 : i32, i32
  }
  func.func @transform_1(%arg0: i32, %arg1: i32) -> (i32, i32) {
    %c1_i32 = arith.constant 1 : i32
    %0 = arith.muli %arg0, %c1_i32 : i32
    %1 = arith.addi %0, %arg1 : i32
    %c0_i32 = arith.constant 0 : i32
    %2 = arith.minsi %1, %c0_i32 : i32
    %c0_i32_0 = arith.constant 0 : i32
    %c0_i32_1 = arith.constant 0 : i32
    return %c0_i32_0, %2 : i32, i32
  }
  func.func @transform_2(%arg0: i32, %arg1: i32) -> (i32, i32, i32) {
    %c0_i32 = arith.constant 0 : i32
    %c0_i32_0 = arith.constant 0 : i32
    %c0_i32_1 = arith.constant 0 : i32
    return %arg0, %c0_i32, %c0_i32_0 : i32, i32, i32
  }
  func.func @transform_3(%arg0: i32, %arg1: i32) -> (i32, i32, i32) {
    %c0_i32 = arith.constant 0 : i32
    %c0_i32_0 = arith.constant 0 : i32
    %c0_i32_1 = arith.constant 0 : i32
    return %arg0, %c0_i32, %c0_i32_0 : i32, i32, i32
  }
}

</mosaic_0001>

<bundles_post_ra>
// kernel: tpu_custom_call.1
= control target key start
LH: loop header
LB: loop body
LE: loop exit
PB: predicated region body
PF: predicated region fallthrough
CT: control target
= control target key end

     0   :  { %9 = vsyncpa [#allocation3], 0  ;;  %s434_s0 = inlined_call_operand.hbm [shape: f32[8,256], index: 0, kind: input, shape index: {}]   ;;  %s435_s1 = inlined_call_operand.hbm [shape: f32[8,256], index: 1, kind: input, shape index: {}]   ;;  %s436_s2 = inlined_call_operand.hbm [shape: f32[1,8,8], index: 2, kind: output, shape index: {0}]   ;;  %s437_s3 = inlined_call_operand.hbm [shape: f32[1,8,8], index: 3, kind: output, shape index: {1}]  }
   0x1   :  { %10 = vsyncpa [#allocation6], 0 }
   0x2   :  { %11 = vsyncpa [#allocation4], 0 }
   0x3   :  { %12 = vsyncpa [#allocation9], 0  ;;  %s357_s12 = smov [#allocation2]   ;;  %s358_s14 = smov [#allocation5]  }
   0x4   :  { %s25_s13 = sshll.u32 %s357_s12, 4  ;;  %s41_s15 = sshll.u32 %s358_s14, 4  ;;  %s26_s13 = int_to_ptr.vmem [resolvable:$true] %s25_s13  ;;  %s42_s15 = int_to_ptr.vmem [resolvable:$true] %s41_s15 }
   0x5   :  { %s261_s18 = scalar_lea.hbm %s434_s0, 256 }
   0x6   :  { %p262_p0 = scmp.ne.s32.totalorder %s434_s0, %s261_s18  ;;  %p265_p1 = scmp.lt.u32.totalorder %s261_s18, %s434_s0 }
   0x8   :  { %p267_p2 = pnand %p265_p1, %p262_p0 }
   0xa   :  { %270 = shalt.err (!%p267_p2)
}
   0xb   :  { %s271_s23 = scalar_lea.vmem %s26_s13, 256  ;;  %p276_p4 = scmp.lt.s32.totalorder %s26_s13, %s26_s13 }
   0xc   :  { %p272_p3 = scmp.ne.s32.totalorder %s26_s13, %s271_s23  ;;  %p277_p5 = scmp.lt.s32.totalorder %s271_s23, %s271_s23 }
   0xe   :  { %p278_p6 = por %p277_p5, %p276_p4 }
  0x10   :  { %p279_p7 = pnand %p278_p6, %p272_p3 }
  0x12   :  { %282 = shalt.err (!%p279_p7)
}
  0x13   :  { %28 = dma.hbm_to_vmem [thread:$0]  %s434_s0, 256, %s26_s13, [#allocation3]  }
  0x14   :  { %s283_s28 = scalar_lea.hbm %s435_s1, 256 }
  0x15   :  { %p284_p8 = scmp.ne.s32.totalorder %s435_s1, %s283_s28  ;;  %p287_p9 = scmp.lt.u32.totalorder %s283_s28, %s435_s1 }
  0x17   :  { %p289_p10 = pnand %p287_p9, %p284_p8 }
  0x19   :  { %292 = shalt.err (!%p289_p10)
}
  0x1a   :  { %s293_s6 = scalar_lea.vmem %s42_s15, 256  ;;  %p298_p12 = scmp.lt.s32.totalorder %s42_s15, %s42_s15 }
  0x1b   :  { %p294_p11 = scmp.ne.s32.totalorder %s42_s15, %s293_s6  ;;  %p299_p13 = scmp.lt.s32.totalorder %s293_s6, %s293_s6 }
  0x1d   :  { %p300_p0 = por %p299_p13, %p298_p12 }
  0x1f   :  { %p301_p1 = pnand %p300_p0, %p294_p11 }
  0x21   :  { %304 = shalt.err (!%p301_p1)
}
  0x22   :  { %44 = dma.hbm_to_vmem [thread:$0]  %s435_s1, 256, %s42_s15, [#allocation6]  }
  0x23   :  { %349 = dma.done.wait [#allocation3], 256  }
  0x24   :  { %350 = vsyncadd [#allocation3], 4294967040 }
  0x25   :  { %351 = dma.done.wait [#allocation6], 256  }
  0x26   :  { %352 = vsyncadd [#allocation6], 4294967040  ;;  %vm64_vm0 = vcmask 64512   ;;  %v359_v0 = vmov 0.0   ;;  %v72_v1 = vld [vmem:[#allocation2 + $0x8] sm:$0xff]  ;;  %v148_v2 = vld [vmem:[#allocation5 + $0x8] sm:$0xff] }
  0x27   :  { %65 = vst.msk [vmem:[#allocation7] sm:$0xff] %vm64_vm0, %v359_v0  ;;  %66 = vst.msk [vmem:[#allocation8] sm:$0xff] %vm64_vm0, %v359_v0  ;;  %v71_v3 = vld [vmem:[#allocation2] sm:$0xff]  ;;  %74 = vmatprep.subr.mxu0 %v72_v1  ;;  %150 = vmatprep.subr.mxu1 %v148_v2  ;;  %v147_v4 = vld [vmem:[#allocation5] sm:$0xff]  ;;  %s360_s1 = smov [#allocation7]   ;;  %s361_s9 = smov [#allocation8]  }
  0x28   :  { %75 = vmatpush1.xpose.msra.mxu0 %v71_v3  ;;  %151 = vmatpush1.xpose.msra.mxu1 %v147_v4  ;;  %s228_s8 = sshll.u32 %s360_s1, 4  ;;  %s238_s10 = sshll.u32 %s361_s9, 4  ;;  %s229_s8 = int_to_ptr.vmem [resolvable:$true] %s228_s8  ;;  %s239_s10 = int_to_ptr.vmem [resolvable:$true] %s238_s10 }
  0x29   :  { %138 = vmatprep.mubr.f32.mxu0 %v72_v1  ;;  %214 = vmatprep.mubr.f32.mxu1 %v148_v2  ;;  %s305_s11 = scalar_lea.vmem %s229_s8, 128  ;;  %p310_p3 = scmp.lt.s32.totalorder %s229_s8, %s229_s8 }
  0x2a   :  { %p306_p2 = scmp.ne.s32.totalorder %s229_s8, %s305_s11  ;;  %p311_p4 = scmp.lt.s32.totalorder %s305_s11, %s305_s11 }
  0x2b   :  { %139 = vmatmul.mubr.f32.vlgmr.msra.gmra.mrb[0].mxu0 %v71_v3  ;;  %215 = vmatmul.mubr.f32.vlgmr.msra.gmra.mrb[0].mxu1 %v147_v4 }
  0x2c   :  { %p312_p5 = por %p311_p4, %p310_p3 }
  0x2e   :  { %v73_v5 = vld [vmem:[#allocation7] sm:$0xff]  ;;  %v149_v6 = vld [vmem:[#allocation8] sm:$0xff]  ;;  %p313_p6 = pnand %p312_p5, %p306_p2 }
  0xfe   :  { %v140_v7 = vpop.f32.mrb[0].mxu0  ;;  %v216_v8 = vpop.f32.mrb[0].mxu1 }
  0xff   :  { %v144_v9 = vadd.f32 %v140_v7, %v73_v5  ;;  %v220_v10 = vadd.f32 %v216_v8, %v149_v6  ;;  %v142_v11 = vpop.f32.mrb[1].mxu0  ;;  %v218_v12 = vpop.f32.mrb[1].mxu1 }
 0x101   :  { %146 = vst.msk [vmem:[#allocation7] sm:$0xff] %vm64_vm0, %v144_v9  ;;  %221 = vst.msk [vmem:[#allocation8] sm:$0xff] %vm64_vm0, %v220_v10 }
 0x102   :  { %316 = shalt.err (!%p313_p6)
}
 0x103   :  { %s317_s14 = scalar_lea.hbm %s436_s2, 128 }
 0x104   :  { %p318_p7 = scmp.ne.s32.totalorder %s436_s2, %s317_s14  ;;  %p321_p8 = scmp.lt.u32.totalorder %s317_s14, %s436_s2 }
 0x106   :  { %p323_p9 = pnand %p321_p8, %p318_p7 }
 0x108   :  { %326 = shalt.err (!%p323_p9)
}
 0x109   :  { %231 = dma.vmem_to_hbm [thread:$0]  %s229_s8, 128, %s436_s2, [#allocation4]  }
 0x10a   :  { %s327_s21 = scalar_lea.vmem %s239_s10, 128  ;;  %p332_p11 = scmp.lt.s32.totalorder %s239_s10, %s239_s10 }
 0x10b   :  { %p328_p10 = scmp.ne.s32.totalorder %s239_s10, %s327_s21  ;;  %p333_p12 = scmp.lt.s32.totalorder %s327_s21, %s327_s21 }
 0x10d   :  { %p334_p13 = por %p333_p12, %p332_p11 }
 0x10f   :  { %p335_p0 = pnand %p334_p13, %p328_p10 }
 0x111   :  { %338 = shalt.err (!%p335_p0)
}
 0x112   :  { %s339_s24 = scalar_lea.hbm %s437_s3, 128 }
 0x113   :  { %p340_p1 = scmp.ne.s32.totalorder %s437_s3, %s339_s24  ;;  %p343_p2 = scmp.lt.u32.totalorder %s339_s24, %s437_s3 }
 0x115   :  { %p345_p3 = pnand %p343_p2, %p340_p1 }
 0x117   :  { %348 = shalt.err (!%p345_p3)
}
 0x118   :  { %241 = dma.vmem_to_hbm [thread:$0]  %s239_s10, 128, %s437_s3, [#allocation9]  }
 0x119   :  { %353 = dma.done.wait [#allocation4], 128  }
 0x11a   :  { %354 = vsyncadd [#allocation4], 4294967168 }
 0x11b   :  { %355 = dma.done.wait [#allocation9], 128  }
 0x11c   :  { %356 = vsyncadd [#allocation9], 4294967168 }
 0x11d   :  { %248 = vsyncpa [#allocation3], 1 }
 0x11e   :  { %249 = vsyncpa [#allocation6], 1 }
 0x11f   :  { %250 = vsyncpa [#allocation4], 1 }
 0x120   :  { %251 = vsyncpa [#allocation9], 1 }

</bundles_post_ra>
